<compile_context>
chip_gen: v6e
topology: v6e:2x2x1
jax: 0.10.0
libtpu: 0.0.40
codegen_flags: <defaults>
</compile_context>

<pallas_src>
import jax
import jax.numpy as jnp
from jax.experimental import pallas as pl
from jax.experimental.pallas import tpu as pltpu

BN_EPS = 1e-5


def _round_up(x, m):
    return (x + m - 1) // m * m


def _pad2(a, rows, cols):
    """Zero-pad a 2-D array up to (rows, cols)."""
    out = jnp.zeros((rows, cols), a.dtype)
    return out.at[: a.shape[0], : a.shape[1]].set(a)


# ----------------------------------------------------------------------------
# Kernel: entire ResidualBlock stack in one invocation (no grid).
# ----------------------------------------------------------------------------
def film_stack_kernel(v_ref, instr_ref, wc1c_ref, wc2_ref, w1_ref, w2_ref,
                      vecs_ref, out_ref):
    NB, Vp, _ = w1_ref.shape

    # ---- Hoisted FiLM conditioning (activation-independent) ----------------
    # Stage 1 for ALL blocks as one wide matmul, stage 2 per block; produces
    # per-block (scale, shift) before (and independent of) the serial residual
    # chain, so the scheduler can overlap it with the chain's matmuls.
    c1_all = jnp.dot(instr_ref[...], wc1c_ref[...],
                     preferred_element_type=jnp.float32)          # (B, NB*Vp)
    scales, shifts = [], []
    for b in range(NB):
        bc1 = vecs_ref[b, 4:5, :]
        bc2_scale = vecs_ref[b, 5:6, :]
        bc2_shift = vecs_ref[b, 6:7, :]
        c1 = jnp.maximum(c1_all[:, b * Vp:(b + 1) * Vp] + bc1, 0.0)
        c = jnp.dot(c1, wc2_ref[b], preferred_element_type=jnp.float32)
        scales.append(c[:, :Vp] + bc2_scale)   # split lands on 128-lane bound
        shifts.append(c[:, Vp:] + bc2_shift)

    # ---- Serial residual chain (fully unrolled) -----------------------------
    act = v_ref[...]
    for b in range(NB):
        b1 = vecs_ref[b, 0:1, :]
        b2 = vecs_ref[b, 1:2, :]
        gamma = vecs_ref[b, 2:3, :]
        beta = vecs_ref[b, 3:4, :]

        # vision_embeddings = ReLU(Linear1(vision_embeddings))
        h = jnp.maximum(
            jnp.dot(act, w1_ref[b], preferred_element_type=jnp.float32) + b1,
            0.0)
        # x = Linear2(h)
        x = jnp.dot(h, w2_ref[b], preferred_element_type=jnp.float32) + b2

        # BatchNorm1d (training-mode stats, biased var) fused with FiLM affine:
        # ((x-m)*inv*g + be)*s + sh == (x-m)*(inv*g*s) + (be*s + sh)
        mean = jnp.mean(x, axis=0, keepdims=True)
        var = jnp.mean((x - mean) ** 2, axis=0, keepdims=True)
        inv = jax.lax.rsqrt(var + BN_EPS)
        eff_scale = (inv * gamma) * scales[b]
        eff_shift = beta * scales[b] + shifts[b]
        x = jnp.maximum((x - mean) * eff_scale + eff_shift, 0.0)

        # Residual: skip connection is the post-Linear1 ReLU activation h.
        act = h + x

    out_ref[...] = act


# ----------------------------------------------------------------------------
# Parameter construction / packing
# ----------------------------------------------------------------------------
def init_block_params(key, vision_dim, instruct_dim):
    """Synthetic parameters for one ResidualBlock (weights stored (in, out))."""
    ks = jax.random.split(key, 4)

    def lin(k, fan_in, fan_out):
        kw, kb = jax.random.split(k)
        bound = 1.0 / jnp.sqrt(fan_in)
        w = jax.random.uniform(kw, (fan_in, fan_out), jnp.float32, -bound, bound)
        b = jax.random.uniform(kb, (fan_out,), jnp.float32, -bound, bound)
        return w, b

    w1, b1 = lin(ks[0], vision_dim, vision_dim)          # Linear1
    w2, b2 = lin(ks[1], vision_dim, vision_dim)          # Linear2
    gamma = jnp.ones((vision_dim,), jnp.float32)         # BatchNorm1d weight
    beta = jnp.zeros((vision_dim,), jnp.float32)         # BatchNorm1d bias
    wc1, bc1 = lin(ks[2], instruct_dim, vision_dim)      # conditioning_linear1
    wc2, bc2 = lin(ks[3], vision_dim, 2 * vision_dim)    # conditioning_linear2
    return (w1, b1, w2, b2, gamma, beta, wc1, bc1, wc2, bc2)


def pack_block_params(blocks_params, vision_dim, instruct_dim):
    """Pad to lane-dense shapes and stack across blocks for one pallas_call."""
    Vp = _round_up(vision_dim, 128)
    Ip = _round_up(instruct_dim, 128)
    V = vision_dim

    w1_l, w2_l, wc2_l, vecs_l, wc1_l = [], [], [], [], []
    for (w1, b1, w2, b2, gamma, beta, wc1, bc1, wc2, bc2) in blocks_params:
        w1_l.append(_pad2(w1, Vp, Vp))
        w2_l.append(_pad2(w2, Vp, Vp))
        wc1_l.append(_pad2(wc1, Ip, Vp))
        # Split wc2/bc2 into scale- and shift-producing halves so the kernel's
        # split sits on a 128-lane boundary after padding.
        wc2_l.append(jnp.concatenate(
            [_pad2(wc2[:, :V], Vp, Vp), _pad2(wc2[:, V:], Vp, Vp)], axis=1))
        rows = [b1, b2, gamma, beta, bc1, bc2[:V], bc2[V:]]
        vec = jnp.zeros((8, Vp), jnp.float32)
        for r, val in enumerate(rows):
            vec = vec.at[r, :V].set(val)
        vecs_l.append(vec)

    return dict(
        wc1_cat=jnp.concatenate(wc1_l, axis=1),    # (Ip, NB*Vp)
        w1=jnp.stack(w1_l),                        # (NB, Vp, Vp)
        w2=jnp.stack(w2_l),                        # (NB, Vp, Vp)
        wc2=jnp.stack(wc2_l),                      # (NB, Vp, 2*Vp)
        vecs=jnp.stack(vecs_l),                    # (NB, 8, Vp)
    )


# ----------------------------------------------------------------------------
# Wrappers
# ----------------------------------------------------------------------------
def film_pallas(v_flat, instruction, packed):
    B, V = v_flat.shape
    NB, Vp, _ = packed["w1"].shape
    Ip = packed["wc1_cat"].shape[0]

    v_p = _pad2(v_flat, B, Vp)
    instr_p = _pad2(instruction, B, Ip)

    # Whole-array VMEM residency (no grid, no double buffering): size the
    # scoped VMEM limit from the true operand footprint, capped at v7x's
    # 64 MiB physical VMEM.
    f32 = 4
    operand_bytes = f32 * (
        B * Vp + B * Ip + Ip * NB * Vp + NB * Vp * 2 * Vp
        + 2 * NB * Vp * Vp + NB * 8 * Vp + B * Vp)
    vmem_limit = min(max(2 * operand_bytes + (4 << 20), 16 << 20), 64 << 20)

    vmem = pltpu.MemorySpace.VMEM
    out_p = pl.pallas_call(
        film_stack_kernel,
        out_shape=jax.ShapeDtypeStruct((B, Vp), jnp.float32),
        in_specs=[pl.BlockSpec(memory_space=vmem)] * 7,
        out_specs=pl.BlockSpec(memory_space=vmem),
        compiler_params=pltpu.CompilerParams(vmem_limit_bytes=vmem_limit),
    )(v_p, instr_p, packed["wc1_cat"], packed["wc2"], packed["w1"],
      packed["w2"], packed["vecs"])
    return out_p[:, :V]


def film_forward(vision_embeddings, instruction_vector, pos_emps, blocks_params,
                 cat=True):
    B = vision_embeddings.shape[0]
    v = vision_embeddings.reshape(B, -1)            # nn.Flatten
    packed = pack_block_params(blocks_params, v.shape[1],
                               instruction_vector.shape[1])
    v = film_pallas(v, instruction_vector, packed)
    if not cat:
        return (v, instruction_vector, pos_emps)
    return jnp.concatenate([v, instruction_vector, pos_emps], axis=1)


def film_reference(vision_embeddings, instruction_vector, pos_emps,
                   blocks_params, cat=True):
    """Pure-JAX reference mirroring the PyTorch module (training-mode BN)."""
    B = vision_embeddings.shape[0]
    v = vision_embeddings.reshape(B, -1)
    hp = jax.lax.Precision.HIGHEST
    for (w1, b1, w2, b2, gamma, beta, wc1, bc1, wc2, bc2) in blocks_params:
        h = jnp.maximum(jnp.dot(v, w1, precision=hp) + b1, 0.0)
        x = jnp.dot(h, w2, precision=hp) + b2
        mean = jnp.mean(x, axis=0, keepdims=True)
        var = jnp.mean((x - mean) ** 2, axis=0, keepdims=True)
        x = (x - mean) * jax.lax.rsqrt(var + BN_EPS) * gamma + beta
        c = jnp.maximum(jnp.dot(instruction_vector, wc1, precision=hp) + bc1, 0.0)
        c = jnp.dot(c, wc2, precision=hp) + bc2
        V = x.shape[1]
        x = jnp.maximum(x * c[:, :V] + c[:, V:], 0.0)
        v = h + x
    if not cat:
        return (v, instruction_vector, pos_emps)
    return jnp.concatenate([v, instruction_vector, pos_emps], axis=1)


if __name__ == "__main__":
    # args.imgs_emps = 32, args.cams has 2 entries -> vision_dim = 64
    # args.instuction_emps = 32, args.film_N_blocks = 2
    B = 8
    imgs_emps, n_cams = 32, 2
    vision_dim = imgs_emps * n_cams
    instruct_dim = 32
    pos_dim = 16
    n_blocks = 2

    key = jax.random.PRNGKey(0)
    k_v, k_i, k_p, k_params = jax.random.split(key, 4)

    vision = jax.random.normal(k_v, (B, n_cams, imgs_emps), jnp.float32)
    instruction = jax.random.normal(k_i, (B, instruct_dim), jnp.float32)
    pos_emps = jax.random.normal(k_p, (B, pos_dim), jnp.float32)

    blocks_params = [
        init_block_params(k, vision_dim, instruct_dim)
        for k in jax.random.split(k_params, n_blocks)
    ]

    out = film_forward(vision, instruction, pos_emps, blocks_params, cat=True)
    out = jax.block_until_ready(out)
    assert out.shape == (B, vision_dim + instruct_dim + pos_dim), out.shape

    ref = film_reference(vision, instruction, pos_emps, blocks_params, cat=True)
    err = float(jnp.max(jnp.abs(out - ref)))
    assert err < 1e-3, f"max abs err vs reference: {err}"

    # TODO(synk): BatchNorm1d running_mean/running_var buffer updates (a
    # training-time side effect) are not tracked; forward uses batch stats.
    print("KERNEL_OK")
</pallas_src>

<mosaic_0001>
module attributes {stable_mosaic.version = 11 : i64} {
  func.func @film_stack_kernel(%arg0: memref<8x128xf32, #tpu.memory_space<vmem>>, %arg1: memref<8x128xf32, #tpu.memory_space<vmem>>, %arg2: memref<128x256xf32, #tpu.memory_space<vmem>>, %arg3: memref<2x128x256xf32, #tpu.memory_space<vmem>>, %arg4: memref<2x128x128xf32, #tpu.memory_space<vmem>>, %arg5: memref<2x128x128xf32, #tpu.memory_space<vmem>>, %arg6: memref<2x8x128xf32, #tpu.memory_space<vmem>>, %arg7: memref<8x128xf32, #tpu.memory_space<vmem>>) attributes {dimension_semantics = [], scalar_prefetch = 0 : i64, scratch_operands = 0 : i64, tpu.core_type = #tpu.core_type<tc>} {
    %c0 = arith.constant 0 : index
    %c0_0 = arith.constant 0 : index
    %0 = vector.load %arg1[%c0, %c0_0] : memref<8x128xf32, #tpu.memory_space<vmem>>, vector<8x128xf32>
    %c0_1 = arith.constant 0 : index
    %c0_2 = arith.constant 0 : index
    %1 = vector.load %arg2[%c0_1, %c0_2] : memref<128x256xf32, #tpu.memory_space<vmem>>, vector<128x256xf32>
    %cst = arith.constant dense<0.000000e+00> : vector<8x256xf32>
    %2 = tpu.matmul %0, %1, %cst {dimension_numbers = #tpu.dot_dimension_numbers<[1], [0], [0], [1], [0, 0, 1, 1], [], []>} : vector<8x128xf32>, vector<128x256xf32>, vector<8x256xf32> -> vector<8x256xf32>
    %c0_3 = arith.constant 0 : index
    %c4 = arith.constant 4 : index
    %c0_4 = arith.constant 0 : index
    %3 = vector.load %arg6[%c0_3, %c4, %c0_4] : memref<2x8x128xf32, #tpu.memory_space<vmem>>, vector<1x1x128xf32>
    %4 = vector.shape_cast %3 : vector<1x1x128xf32> to vector<1x128xf32>
    %c0_5 = arith.constant 0 : index
    %c5 = arith.constant 5 : index
    %c0_6 = arith.constant 0 : index
    %5 = vector.load %arg6[%c0_5, %c5, %c0_6] : memref<2x8x128xf32, #tpu.memory_space<vmem>>, vector<1x1x128xf32>
    %6 = vector.shape_cast %5 : vector<1x1x128xf32> to vector<1x128xf32>
    %c0_7 = arith.constant 0 : index
    %c6 = arith.constant 6 : index
    %c0_8 = arith.constant 0 : index
    %7 = vector.load %arg6[%c0_7, %c6, %c0_8] : memref<2x8x128xf32, #tpu.memory_space<vmem>>, vector<1x1x128xf32>
    %8 = vector.shape_cast %7 : vector<1x1x128xf32> to vector<1x128xf32>
    %9 = vector.extract_strided_slice %2 {offsets = [0, 0], sizes = [8, 128], strides = [1, 1]} : vector<8x256xf32> to vector<8x128xf32>
    %10 = vector.broadcast %4 : vector<1x128xf32> to vector<8x128xf32>
    %11 = arith.addf %9, %10 : vector<8x128xf32>
    %cst_9 = arith.constant 0.000000e+00 : f32
    %12 = vector.broadcast %cst_9 : f32 to vector<8x128xf32>
    %13 = arith.maximumf %11, %12 : vector<8x128xf32>
    %c0_10 = arith.constant 0 : index
    %c0_11 = arith.constant 0 : index
    %c0_12 = arith.constant 0 : index
    %14 = vector.load %arg3[%c0_10, %c0_11, %c0_12] : memref<2x128x256xf32, #tpu.memory_space<vmem>>, vector<1x128x256xf32>
    %15 = vector.shape_cast %14 : vector<1x128x256xf32> to vector<128x256xf32>
    %cst_13 = arith.constant dense<0.000000e+00> : vector<8x256xf32>
    %16 = tpu.matmul %13, %15, %cst_13 {dimension_numbers = #tpu.dot_dimension_numbers<[1], [0], [0], [1], [0, 0, 1, 1], [], []>} : vector<8x128xf32>, vector<128x256xf32>, vector<8x256xf32> -> vector<8x256xf32>
    %17 = vector.extract_strided_slice %16 {offsets = [0, 0], sizes = [8, 128], strides = [1, 1]} : vector<8x256xf32> to vector<8x128xf32>
    %18 = vector.broadcast %6 : vector<1x128xf32> to vector<8x128xf32>
    %19 = arith.addf %17, %18 : vector<8x128xf32>
    %20 = vector.extract_strided_slice %16 {offsets = [0, 128], sizes = [8, 128], strides = [1, 1]} : vector<8x256xf32> to vector<8x128xf32>
    %21 = vector.broadcast %8 : vector<1x128xf32> to vector<8x128xf32>
    %22 = arith.addf %20, %21 : vector<8x128xf32>
    %c1 = arith.constant 1 : index
    %c4_14 = arith.constant 4 : index
    %c0_15 = arith.constant 0 : index
    %23 = vector.load %arg6[%c1, %c4_14, %c0_15] : memref<2x8x128xf32, #tpu.memory_space<vmem>>, vector<1x1x128xf32>
    %24 = vector.shape_cast %23 : vector<1x1x128xf32> to vector<1x128xf32>
    %c1_16 = arith.constant 1 : index
    %c5_17 = arith.constant 5 : index
    %c0_18 = arith.constant 0 : index
    %25 = vector.load %arg6[%c1_16, %c5_17, %c0_18] : memref<2x8x128xf32, #tpu.memory_space<vmem>>, vector<1x1x128xf32>
    %26 = vector.shape_cast %25 : vector<1x1x128xf32> to vector<1x128xf32>
    %c1_19 = arith.constant 1 : index
    %c6_20 = arith.constant 6 : index
    %c0_21 = arith.constant 0 : index
    %27 = vector.load %arg6[%c1_19, %c6_20, %c0_21] : memref<2x8x128xf32, #tpu.memory_space<vmem>>, vector<1x1x128xf32>
    %28 = vector.shape_cast %27 : vector<1x1x128xf32> to vector<1x128xf32>
    %29 = vector.extract_strided_slice %2 {offsets = [0, 128], sizes = [8, 128], strides = [1, 1]} : vector<8x256xf32> to vector<8x128xf32>
    %30 = vector.broadcast %24 : vector<1x128xf32> to vector<8x128xf32>
    %31 = arith.addf %29, %30 : vector<8x128xf32>
    %cst_22 = arith.constant 0.000000e+00 : f32
    %32 = vector.broadcast %cst_22 : f32 to vector<8x128xf32>
    %33 = arith.maximumf %31, %32 : vector<8x128xf32>
    %c1_23 = arith.constant 1 : index
    %c0_24 = arith.constant 0 : index
    %c0_25 = arith.constant 0 : index
    %34 = vector.load %arg3[%c1_23, %c0_24, %c0_25] : memref<2x128x256xf32, #tpu.memory_space<vmem>>, vector<1x128x256xf32>
    %35 = vector.shape_cast %34 : vector<1x128x256xf32> to vector<128x256xf32>
    %cst_26 = arith.constant dense<0.000000e+00> : vector<8x256xf32>
    %36 = tpu.matmul %33, %35, %cst_26 {dimension_numbers = #tpu.dot_dimension_numbers<[1], [0], [0], [1], [0, 0, 1, 1], [], []>} : vector<8x128xf32>, vector<128x256xf32>, vector<8x256xf32> -> vector<8x256xf32>
    %37 = vector.extract_strided_slice %36 {offsets = [0, 0], sizes = [8, 128], strides = [1, 1]} : vector<8x256xf32> to vector<8x128xf32>
    %38 = vector.broadcast %26 : vector<1x128xf32> to vector<8x128xf32>
    %39 = arith.addf %37, %38 : vector<8x128xf32>
    %40 = vector.extract_strided_slice %36 {offsets = [0, 128], sizes = [8, 128], strides = [1, 1]} : vector<8x256xf32> to vector<8x128xf32>
    %41 = vector.broadcast %28 : vector<1x128xf32> to vector<8x128xf32>
    %42 = arith.addf %40, %41 : vector<8x128xf32>
    %c0_27 = arith.constant 0 : index
    %c0_28 = arith.constant 0 : index
    %43 = vector.load %arg0[%c0_27, %c0_28] : memref<8x128xf32, #tpu.memory_space<vmem>>, vector<8x128xf32>
    %c0_29 = arith.constant 0 : index
    %c0_30 = arith.constant 0 : index
    %c0_31 = arith.constant 0 : index
    %44 = vector.load %arg6[%c0_29, %c0_30, %c0_31] : memref<2x8x128xf32, #tpu.memory_space<vmem>>, vector<1x1x128xf32>
    %45 = vector.shape_cast %44 : vector<1x1x128xf32> to vector<1x128xf32>
    %c0_32 = arith.constant 0 : index
    %c1_33 = arith.constant 1 : index
    %c0_34 = arith.constant 0 : index
    %46 = vector.load %arg6[%c0_32, %c1_33, %c0_34] : memref<2x8x128xf32, #tpu.memory_space<vmem>>, vector<1x1x128xf32>
    %47 = vector.shape_cast %46 : vector<1x1x128xf32> to vector<1x128xf32>
    %c0_35 = arith.constant 0 : index
    %c2 = arith.constant 2 : index
    %c0_36 = arith.constant 0 : index
    %48 = vector.load %arg6[%c0_35, %c2, %c0_36] : memref<2x8x128xf32, #tpu.memory_space<vmem>>, vector<1x1x128xf32>
    %49 = vector.shape_cast %48 : vector<1x1x128xf32> to vector<1x128xf32>
    %c0_37 = arith.constant 0 : index
    %c3 = arith.constant 3 : index
    %c0_38 = arith.constant 0 : index
    %50 = vector.load %arg6[%c0_37, %c3, %c0_38] : memref<2x8x128xf32, #tpu.memory_space<vmem>>, vector<1x1x128xf32>
    %51 = vector.shape_cast %50 : vector<1x1x128xf32> to vector<1x128xf32>
    %c0_39 = arith.constant 0 : index
    %c0_40 = arith.constant 0 : index
    %c0_41 = arith.constant 0 : index
    %52 = vector.load %arg4[%c0_39, %c0_40, %c0_41] : memref<2x128x128xf32, #tpu.memory_space<vmem>>, vector<1x128x128xf32>
    %53 = vector.shape_cast %52 : vector<1x128x128xf32> to vector<128x128xf32>
    %cst_42 = arith.constant dense<0.000000e+00> : vector<8x128xf32>
    %54 = tpu.matmul %43, %53, %cst_42 {dimension_numbers = #tpu.dot_dimension_numbers<[1], [0], [0], [1], [0, 0, 1, 1], [], []>} : vector<8x128xf32>, vector<128x128xf32>, vector<8x128xf32> -> vector<8x128xf32>
    %55 = vector.broadcast %45 : vector<1x128xf32> to vector<8x128xf32>
    %56 = arith.addf %54, %55 : vector<8x128xf32>
    %cst_43 = arith.constant 0.000000e+00 : f32
    %57 = vector.broadcast %cst_43 : f32 to vector<8x128xf32>
    %58 = arith.maximumf %56, %57 : vector<8x128xf32>
    %c0_44 = arith.constant 0 : index
    %c0_45 = arith.constant 0 : index
    %c0_46 = arith.constant 0 : index
    %59 = vector.load %arg5[%c0_44, %c0_45, %c0_46] : memref<2x128x128xf32, #tpu.memory_space<vmem>>, vector<1x128x128xf32>
    %60 = vector.shape_cast %59 : vector<1x128x128xf32> to vector<128x128xf32>
    %cst_47 = arith.constant dense<0.000000e+00> : vector<8x128xf32>
    %61 = tpu.matmul %58, %60, %cst_47 {dimension_numbers = #tpu.dot_dimension_numbers<[1], [0], [0], [1], [0, 0, 1, 1], [], []>} : vector<8x128xf32>, vector<128x128xf32>, vector<8x128xf32> -> vector<8x128xf32>
    %62 = vector.broadcast %47 : vector<1x128xf32> to vector<8x128xf32>
    %63 = arith.addf %61, %62 : vector<8x128xf32>
    %cst_48 = arith.constant dense<0.000000e+00> : vector<128xf32>
    %64 = vector.multi_reduction <add>, %63, %cst_48 [0] : vector<8x128xf32> to vector<128xf32>
    %65 = vector.shape_cast %64 : vector<128xf32> to vector<1x128xf32>
    %cst_49 = arith.constant 8.000000e+00 : f32
    %66 = vector.broadcast %cst_49 : f32 to vector<1x128xf32>
    %67 = arith.divf %65, %66 : vector<1x128xf32>
    %68 = vector.broadcast %67 : vector<1x128xf32> to vector<8x128xf32>
    %69 = arith.subf %63, %68 : vector<8x128xf32>
    %70 = arith.mulf %69, %69 : vector<8x128xf32>
    %cst_50 = arith.constant dense<0.000000e+00> : vector<128xf32>
    %71 = vector.multi_reduction <add>, %70, %cst_50 [0] : vector<8x128xf32> to vector<128xf32>
    %72 = vector.shape_cast %71 : vector<128xf32> to vector<1x128xf32>
    %cst_51 = arith.constant 8.000000e+00 : f32
    %73 = vector.broadcast %cst_51 : f32 to vector<1x128xf32>
    %74 = arith.divf %72, %73 : vector<1x128xf32>
    %cst_52 = arith.constant 9.99999974E-6 : f32
    %75 = vector.broadcast %cst_52 : f32 to vector<1x128xf32>
    %76 = arith.addf %74, %75 : vector<1x128xf32>
    %77 = math.rsqrt %76 : vector<1x128xf32>
    %78 = arith.mulf %77, %49 : vector<1x128xf32>
    %79 = vector.broadcast %78 : vector<1x128xf32> to vector<8x128xf32>
    %80 = arith.mulf %79, %19 : vector<8x128xf32>
    %81 = vector.broadcast %51 : vector<1x128xf32> to vector<8x128xf32>
    %82 = arith.mulf %81, %19 : vector<8x128xf32>
    %83 = arith.addf %82, %22 : vector<8x128xf32>
    %84 = vector.broadcast %67 : vector<1x128xf32> to vector<8x128xf32>
    %85 = arith.subf %63, %84 : vector<8x128xf32>
    %86 = arith.mulf %85, %80 : vector<8x128xf32>
    %87 = arith.addf %86, %83 : vector<8x128xf32>
    %cst_53 = arith.constant 0.000000e+00 : f32
    %88 = vector.broadcast %cst_53 : f32 to vector<8x128xf32>
    %89 = arith.maximumf %87, %88 : vector<8x128xf32>
    %90 = arith.addf %58, %89 : vector<8x128xf32>
    %c1_54 = arith.constant 1 : index
    %c0_55 = arith.constant 0 : index
    %c0_56 = arith.constant 0 : index
    %91 = vector.load %arg6[%c1_54, %c0_55, %c0_56] : memref<2x8x128xf32, #tpu.memory_space<vmem>>, vector<1x1x128xf32>
    %92 = vector.shape_cast %91 : vector<1x1x128xf32> to vector<1x128xf32>
    %c1_57 = arith.constant 1 : index
    %c1_58 = arith.constant 1 : index
    %c0_59 = arith.constant 0 : index
    %93 = vector.load %arg6[%c1_57, %c1_58, %c0_59] : memref<2x8x128xf32, #tpu.memory_space<vmem>>, vector<1x1x128xf32>
    %94 = vector.shape_cast %93 : vector<1x1x128xf32> to vector<1x128xf32>
    %c1_60 = arith.constant 1 : index
    %c2_61 = arith.constant 2 : index
    %c0_62 = arith.constant 0 : index
    %95 = vector.load %arg6[%c1_60, %c2_61, %c0_62] : memref<2x8x128xf32, #tpu.memory_space<vmem>>, vector<1x1x128xf32>
    %96 = vector.shape_cast %95 : vector<1x1x128xf32> to vector<1x128xf32>
    %c1_63 = arith.constant 1 : index
    %c3_64 = arith.constant 3 : index
    %c0_65 = arith.constant 0 : index
    %97 = vector.load %arg6[%c1_63, %c3_64, %c0_65] : memref<2x8x128xf32, #tpu.memory_space<vmem>>, vector<1x1x128xf32>
    %98 = vector.shape_cast %97 : vector<1x1x128xf32> to vector<1x128xf32>
    %c1_66 = arith.constant 1 : index
    %c0_67 = arith.constant 0 : index
    %c0_68 = arith.constant 0 : index
    %99 = vector.load %arg4[%c1_66, %c0_67, %c0_68] : memref<2x128x128xf32, #tpu.memory_space<vmem>>, vector<1x128x128xf32>
    %100 = vector.shape_cast %99 : vector<1x128x128xf32> to vector<128x128xf32>
    %cst_69 = arith.constant dense<0.000000e+00> : vector<8x128xf32>
    %101 = tpu.matmul %90, %100, %cst_69 {dimension_numbers = #tpu.dot_dimension_numbers<[1], [0], [0], [1], [0, 0, 1, 1], [], []>} : vector<8x128xf32>, vector<128x128xf32>, vector<8x128xf32> -> vector<8x128xf32>
    %102 = vector.broadcast %92 : vector<1x128xf32> to vector<8x128xf32>
    %103 = arith.addf %101, %102 : vector<8x128xf32>
    %cst_70 = arith.constant 0.000000e+00 : f32
    %104 = vector.broadcast %cst_70 : f32 to vector<8x128xf32>
    %105 = arith.maximumf %103, %104 : vector<8x128xf32>
    %c1_71 = arith.constant 1 : index
    %c0_72 = arith.constant 0 : index
    %c0_73 = arith.constant 0 : index
    %106 = vector.load %arg5[%c1_71, %c0_72, %c0_73] : memref<2x128x128xf32, #tpu.memory_space<vmem>>, vector<1x128x128xf32>
    %107 = vector.shape_cast %106 : vector<1x128x128xf32> to vector<128x128xf32>
    %cst_74 = arith.constant dense<0.000000e+00> : vector<8x128xf32>
    %108 = tpu.matmul %105, %107, %cst_74 {dimension_numbers = #tpu.dot_dimension_numbers<[1], [0], [0], [1], [0, 0, 1, 1], [], []>} : vector<8x128xf32>, vector<128x128xf32>, vector<8x128xf32> -> vector<8x128xf32>
    %109 = vector.broadcast %94 : vector<1x128xf32> to vector<8x128xf32>
    %110 = arith.addf %108, %109 : vector<8x128xf32>
    %cst_75 = arith.constant dense<0.000000e+00> : vector<128xf32>
    %111 = vector.multi_reduction <add>, %110, %cst_75 [0] : vector<8x128xf32> to vector<128xf32>
    %112 = vector.shape_cast %111 : vector<128xf32> to vector<1x128xf32>
    %cst_76 = arith.constant 8.000000e+00 : f32
    %113 = vector.broadcast %cst_76 : f32 to vector<1x128xf32>
    %114 = arith.divf %112, %113 : vector<1x128xf32>
    %115 = vector.broadcast %114 : vector<1x128xf32> to vector<8x128xf32>
    %116 = arith.subf %110, %115 : vector<8x128xf32>
    %117 = arith.mulf %116, %116 : vector<8x128xf32>
    %cst_77 = arith.constant dense<0.000000e+00> : vector<128xf32>
    %118 = vector.multi_reduction <add>, %117, %cst_77 [0] : vector<8x128xf32> to vector<128xf32>
    %119 = vector.shape_cast %118 : vector<128xf32> to vector<1x128xf32>
    %cst_78 = arith.constant 8.000000e+00 : f32
    %120 = vector.broadcast %cst_78 : f32 to vector<1x128xf32>
    %121 = arith.divf %119, %120 : vector<1x128xf32>
    %cst_79 = arith.constant 9.99999974E-6 : f32
    %122 = vector.broadcast %cst_79 : f32 to vector<1x128xf32>
    %123 = arith.addf %121, %122 : vector<1x128xf32>
    %124 = math.rsqrt %123 : vector<1x128xf32>
    %125 = arith.mulf %124, %96 : vector<1x128xf32>
    %126 = vector.broadcast %125 : vector<1x128xf32> to vector<8x128xf32>
    %127 = arith.mulf %126, %39 : vector<8x128xf32>
    %128 = vector.broadcast %98 : vector<1x128xf32> to vector<8x128xf32>
    %129 = arith.mulf %128, %39 : vector<8x128xf32>
    %130 = arith.addf %129, %42 : vector<8x128xf32>
    %131 = vector.broadcast %114 : vector<1x128xf32> to vector<8x128xf32>
    %132 = arith.subf %110, %131 : vector<8x128xf32>
    %133 = arith.mulf %132, %127 : vector<8x128xf32>
    %134 = arith.addf %133, %130 : vector<8x128xf32>
    %cst_80 = arith.constant 0.000000e+00 : f32
    %135 = vector.broadcast %cst_80 : f32 to vector<8x128xf32>
    %136 = arith.maximumf %134, %135 : vector<8x128xf32>
    %137 = arith.addf %105, %136 : vector<8x128xf32>
    %c0_81 = arith.constant 0 : index
    %c0_82 = arith.constant 0 : index
    %138 = vector.load %arg7[%c0_81, %c0_82] : memref<8x128xf32, #tpu.memory_space<vmem>>, vector<8x128xf32>
    tpu.vector_store %arg7[%c0_81, %c0_82], %137 {strides = array<i32>} : memref<8x128xf32, #tpu.memory_space<vmem>>, vector<8x128xf32>,
    return
  }
}

</mosaic_0001>

<bundles_post_ra>
// kernel: tpu_custom_call.1
= control target key start
LH: loop header
LB: loop body
LE: loop exit
PB: predicated region body
PF: predicated region fallthrough
CT: control target
= control target key end

     0   :  { %12 = vsyncpa [#allocation3], 0  ;;  %s1525_s0 = inlined_call_operand.hbm [shape: f32[8,128], index: 0, kind: input, shape index: {}]   ;;  %s1526_s1 = inlined_call_operand.hbm [shape: f32[8,128], index: 1, kind: input, shape index: {}]   ;;  %s1527_s2 = inlined_call_operand.hbm [shape: f32[128,256], index: 2, kind: input, shape index: {}]   ;;  %s1528_s3 = inlined_call_operand.hbm [shape: f32[2,128,256], index: 3, kind: input, shape index: {}]   ;;  %s1529_s4 = inlined_call_operand.hbm [shape: f32[2,128,128], index: 4, kind: input, shape index: {}]   ;;  %s1530_s5 = inlined_call_operand.hbm [shape: f32[2,128,128], index: 5, kind: input, shape index: {}]   ;;  %s1531_s6 = inlined_call_operand.hbm [shape: f32[2,8,128], index: 6, kind: input, shape index: {}]   ;;  %s1532_s7 = inlined_call_operand.hbm [shape: f32[8,128], index: 7, kind: output, shape index: {}]  }
   0x1   :  { %13 = vsyncpa [#allocation6], 0 }
   0x2   :  { %14 = vsyncpa [#allocation9], 0 }
   0x3   :  { %15 = vsyncpa [#allocation12], 0 }
   0x4   :  { %16 = vsyncpa [#allocation4], 0  ;;  %s1337_s24 = smov [#allocation5]  }
   0x5   :  { %s33_s25 = sshll.u32 %s1337_s24, 4  ;;  %s34_s25 = int_to_ptr.vmem [resolvable:$true] %s33_s25 }
   0x6   :  { %s1175_s26 = scalar_lea.vmem %s34_s25, 128  ;;  %p1180_p1 = scmp.lt.s32.totalorder %s34_s25, %s34_s25 }
   0x7   :  { %p1176_p0 = scmp.ne.s32.totalorder %s34_s25, %s1175_s26  ;;  %p1181_p2 = scmp.lt.s32.totalorder %s1175_s26, %s1175_s26 }
   0x9   :  { %p1182_p3 = por %p1181_p2, %p1180_p1 }
   0xb   :  { %p1183_p4 = pnand %p1182_p3, %p1176_p0 }
   0xd   :  { %1186 = shalt.err (!%p1183_p4)
}
   0xe   :  { %36 = dma.hbm_to_vmem [thread:$0]  %s1526_s1, 128, %s34_s25, [#allocation6]  }
   0xf   :  { %s1338_s29 = smov [#allocation8]  }
  0x10   :  { %s54_s30 = sshll.u32 %s1338_s29, 4  ;;  %s55_s30 = int_to_ptr.vmem [resolvable:$true] %s54_s30 }
  0x11   :  { %s1195_s8 = scalar_lea.vmem %s55_s30, 8192  ;;  %p1200_p6 = scmp.lt.s32.totalorder %s55_s30, %s55_s30 }
  0x12   :  { %p1196_p5 = scmp.ne.s32.totalorder %s55_s30, %s1195_s8  ;;  %p1201_p7 = scmp.lt.s32.totalorder %s1195_s8, %s1195_s8 }
  0x14   :  { %p1202_p8 = por %p1201_p7, %p1200_p6 }
  0x16   :  { %p1203_p9 = pnand %p1202_p8, %p1196_p5 }
  0x18   :  { %1206 = shalt.err (!%p1203_p9)
}
  0x19   :  { %s1339_s9 = smov 256   ;;  %s1340_s10 = smov 16  }
  0x1a   :  { %60 = dma.hbm_to_vmem [thread:$0]  %s1528_s3, 8192, %s55_s30, [#allocation9], %s1339_s9, %s1339_s9, %s1340_s10  }
  0x1b   :  { %s1341_s1 = smov [#allocation11]   ;;  %s1342_s14 = smov [#allocation2]  }
  0x1c   :  { %s78_s13 = sshll.u32 %s1341_s1, 4  ;;  %s23_s15 = sshll.u32 %s1342_s14, 4  ;;  %s79_s13 = int_to_ptr.vmem [resolvable:$true] %s78_s13  ;;  %s24_s15 = int_to_ptr.vmem [resolvable:$true] %s23_s15 }
  0x1d   :  { %s1215_s16 = scalar_lea.vmem %s79_s13, 4096  ;;  %p1220_p11 = scmp.lt.s32.totalorder %s79_s13, %s79_s13 }
  0x1e   :  { %p1216_p10 = scmp.ne.s32.totalorder %s79_s13, %s1215_s16  ;;  %p1221_p12 = scmp.lt.s32.totalorder %s1215_s16, %s1215_s16 }
  0x20   :  { %p1222_p13 = por %p1221_p12, %p1220_p11 }
  0x22   :  { %p1223_p0 = pnand %p1222_p13, %p1216_p10 }
  0x24   :  { %1226 = shalt.err (!%p1223_p0)
}
  0x25   :  { %s1343_s17 = smov 128   ;;  %s1344_s18 = smov 8  }
  0x26   :  { %84 = dma.hbm_to_vmem [thread:$0]  %s1530_s5, 4096, %s79_s13, [#allocation12], %s1343_s17, %s1343_s17, %s1344_s18  }
  0x27   :  { %s1235_s20 = scalar_lea.vmem %s24_s15, 128  ;;  %p1240_p2 = scmp.lt.s32.totalorder %s24_s15, %s24_s15 }
  0x28   :  { %p1236_p1 = scmp.ne.s32.totalorder %s24_s15, %s1235_s20  ;;  %p1241_p3 = scmp.lt.s32.totalorder %s1235_s20, %s1235_s20 }
  0x2a   :  { %p1242_p4 = por %p1241_p3, %p1240_p2 }
  0x2c   :  { %p1243_p5 = pnand %p1242_p4, %p1236_p1 }
  0x2e   :  { %1246 = shalt.err (!%p1243_p5)
}
  0x2f   :  { %26 = dma.hbm_to_vmem [thread:$0]  %s1525_s0, 128, %s24_s15, [#allocation3]  }
  0x30   :  { %s1345_s23 = smov [#allocation7]   ;;  %s1346_s25 = smov [#allocation10]  }
  0x31   :  { %s42_s24 = sshll.u32 %s1345_s23, 4  ;;  %s66_s26 = sshll.u32 %s1346_s25, 4  ;;  %s43_s24 = int_to_ptr.vmem [resolvable:$true] %s42_s24  ;;  %s67_s26 = int_to_ptr.vmem [resolvable:$true] %s66_s26 }
  0x32   :  { %s1255_s27 = scalar_lea.vmem %s43_s24, 4096  ;;  %p1260_p7 = scmp.lt.s32.totalorder %s43_s24, %s43_s24 }
  0x33   :  { %p1256_p6 = scmp.ne.s32.totalorder %s43_s24, %s1255_s27  ;;  %p1261_p8 = scmp.lt.s32.totalorder %s1255_s27, %s1255_s27 }
  0x35   :  { %p1262_p9 = por %p1261_p8, %p1260_p7 }
  0x37   :  { %p1263_p10 = pnand %p1262_p9, %p1256_p6 }
  0x39   :  { %1266 = shalt.err (!%p1263_p10)
}
  0x3a   :  { %48 = dma.hbm_to_vmem [thread:$0]  %s1527_s2, 4096, %s43_s24, [#allocation6], %s1339_s9, %s1339_s9, %s1340_s10  }
  0x3b   :  { %s1275_s0 = scalar_lea.vmem %s67_s26, 4096  ;;  %p1280_p12 = scmp.lt.s32.totalorder %s67_s26, %s67_s26 }
  0x3c   :  { %p1276_p11 = scmp.ne.s32.totalorder %s67_s26, %s1275_s0  ;;  %p1281_p13 = scmp.lt.s32.totalorder %s1275_s0, %s1275_s0 }
  0x3e   :  { %p1282_p0 = por %p1281_p13, %p1280_p12 }
  0x40   :  { %p1283_p1 = pnand %p1282_p0, %p1276_p11 }
  0x42   :  { %1286 = shalt.err (!%p1283_p1)
}
  0x43   :  { %72 = dma.hbm_to_vmem [thread:$0]  %s1529_s4, 4096, %s67_s26, [#allocation9], %s1343_s17, %s1343_s17, %s1344_s18  }
  0x44   :  { %s1347_s8 = smov [#allocation13]  }
  0x45   :  { %s90_s11 = sshll.u32 %s1347_s8, 4  ;;  %s91_s11 = int_to_ptr.vmem [resolvable:$true] %s90_s11 }
  0x46   :  { %s1295_s12 = scalar_lea.vmem %s91_s11, 256  ;;  %p1300_p3 = scmp.lt.s32.totalorder %s91_s11, %s91_s11 }
  0x47   :  { %p1296_p2 = scmp.ne.s32.totalorder %s91_s11, %s1295_s12  ;;  %p1301_p4 = scmp.lt.s32.totalorder %s1295_s12, %s1295_s12 }
  0x49   :  { %p1302_p5 = por %p1301_p4, %p1300_p3 }
  0x4b   :  { %p1303_p6 = pnand %p1302_p5, %p1296_p2 }
  0x4d   :  { %1306 = shalt.err (!%p1303_p6)
}
  0x4e   :  { %96 = dma.hbm_to_vmem [thread:$0]  %s1531_s6, 256, %s91_s11, [#allocation12], %s1343_s17, %s1343_s17, %s1344_s18  }
  0x4f   :  { %1327 = dma.done.wait [#allocation3], 128  }
  0x50   :  { %1328 = vsyncadd [#allocation3], 4294967168 }
  0x51   :  { %1329 = dma.done.wait [#allocation6], 4224  }
  0x52   :  { %1330 = vsyncadd [#allocation6], 4294963072 }
  0x53   :  { %1331 = dma.done.wait [#allocation9], 12288  }
  0x54   :  { %1332 = vsyncadd [#allocation9], 4294955008 }
  0x55   :  { %1333 = dma.done.wait [#allocation12], 4352  }
  0x56   :  { %1334 = vsyncadd [#allocation12], 4294962944  ;;  %v1348_v0 = vmov 0.0   ;;  %v150_v1 = vld [vmem:[#allocation7 + $0xf8] sm:$0xff]  ;;  %v149_v2 = vld [vmem:[#allocation7 + $0xf0] sm:$0xff]  ;;  %vm1349_vm0 = vmmov 0  }
  0x57   :  { %215 = vmatprep.mubr.f32.mxu0 %v1348_v0  ;;  %327 = vmatprep.mubr.f32.mxu1 %v1348_v0  ;;  %v148_v3 = vld [vmem:[#allocation7 + $0xe8] sm:$0xff]  ;;  %v147_v4 = vld [vmem:[#allocation7 + $0xe0] sm:$0xff]  ;;  %v146_v5 = vld [vmem:[#allocation7 + $0xd8] sm:$0xff]  ;;  %s1350_s4 = smov [#allocation14]  }
  0x58   :  { %151 = vmatprep.subr.mxu0 %v150_v1  ;;  %v145_v6 = vld [vmem:[#allocation7 + $0xd0] sm:$0xff]  ;;  %v144_v7 = vld [vmem:[#allocation7 + $0xc8] sm:$0xff]  ;;  %v143_v8 = vld [vmem:[#allocation7 + $0xc0] sm:$0xff]  ;;  %s917_s6 = sshll.u32 %s1350_s4, 4  ;;  %s918_s6 = int_to_ptr.vmem [resolvable:$true] %s917_s6 }
  0x59   :  { %152 = vmatpush1.msra.mxu0 %v149_v2  ;;  %v142_v9 = vld [vmem:[#allocation7 + $0xb8] sm:$0xff]  ;;  %v141_v10 = vld [vmem:[#allocation7 + $0xb0] sm:$0xff]  ;;  %v140_v11 = vld [vmem:[#allocation7 + $0xa8] sm:$0xff]  ;;  %s1307_s10 = scalar_lea.vmem %s918_s6, 128  ;;  %p1312_p8 = scmp.lt.s32.totalorder %s918_s6, %s918_s6 }
  0x5a   :  { %153 = vmatprep.subr.mxu0 %v148_v3  ;;  %v139_v12 = vld [vmem:[#allocation7 + $0xa0] sm:$0xff]  ;;  %v138_v13 = vld [vmem:[#allocation7 + $0x98] sm:$0xff]  ;;  %v137_v14 = vld [vmem:[#allocation7 + $0x90] sm:$0xff]  ;;  %p1308_p7 = scmp.ne.s32.totalorder %s918_s6, %s1307_s10  ;;  %p1313_p9 = scmp.lt.s32.totalorder %s1307_s10, %s1307_s10 }
  0x5b   :  { %154 = vmatpush1.msra.mxu0 %v147_v4  ;;  %v262_v15 = vld [vmem:[#allocation8 + $0xf8] sm:$0xff]  ;;  %v261_v16 = vld [vmem:[#allocation8 + $0xf0] sm:$0xff]  ;;  %v260_v17 = vld [vmem:[#allocation8 + $0xe8] sm:$0xff] }
  0x5c   :  { %155 = vmatprep.subr.mxu0 %v146_v5  ;;  %v136_v18 = vld [vmem:[#allocation7 + $0x88] sm:$0xff]  ;;  %263 = vmatprep.subr.mxu1 %v262_v15  ;;  %v259_v19 = vld [vmem:[#allocation8 + $0xe0] sm:$0xff]  ;;  %v258_v21 = vld [vmem:[#allocation8 + $0xd8] sm:$0xff]  ;;  %p1314_p10 = por %p1313_p9, %p1312_p8 }
  0x5d   :  { %156 = vmatpush1.msra.mxu0 %v145_v6  ;;  %v135_v20 = vld [vmem:[#allocation7 + $0x80] sm:$0xff]  ;;  %264 = vmatpush1.msra.mxu1 %v261_v16  ;;  %v134_v22 = vld [vmem:[#allocation7 + $0x78] sm:$0xff]  ;;  %v257_v23 = vld [vmem:[#allocation8 + $0xd0] sm:$0xff] }
  0x5e   :  { %157 = vmatprep.subr.mxu0 %v144_v7  ;;  %265 = vmatprep.subr.mxu1 %v260_v17  ;;  %v133_v24 = vld [vmem:[#allocation7 + $0x70] sm:$0xff]  ;;  %v256_v25 = vld [vmem:[#allocation8 + $0xc8] sm:$0xff]  ;;  %v255_v27 = vld [vmem:[#allocation8 + $0xc0] sm:$0xff]  ;;  %p1315_p11 = pnand %p1314_p10, %p1308_p7 }
  0x5f   :  { %158 = vmatpush1.msra.mxu0 %v143_v8  ;;  %266 = vmatpush1.msra.mxu1 %v259_v19  ;;  %v132_v26 = vld [vmem:[#allocation7 + $0x68] sm:$0xff]  ;;  %v131_v28 = vld [vmem:[#allocation7 + $0x60] sm:$0xff]  ;;  %v254_v29 = vld [vmem:[#allocation8 + $0xb8] sm:$0xff] }
  0x60   :  { %159 = vmatprep.subr.mxu0 %v142_v9  ;;  %267 = vmatprep.subr.mxu1 %v258_v21  ;;  %v130_v30 = vld [vmem:[#allocation7 + $0x58] sm:$0xff]  ;;  %v253_v31 = vld [vmem:[#allocation8 + $0xb0] sm:$0xff]  ;;  %v252_v33 = vld [vmem:[#allocation8 + $0xa8] sm:$0xff] }
  0x61   :  { %160 = vmatpush1.msra.mxu0 %v141_v10  ;;  %268 = vmatpush1.msra.mxu1 %v257_v23  ;;  %v129_v32 = vld [vmem:[#allocation7 + $0x50] sm:$0xff]  ;;  %v128_v34 = vld [vmem:[#allocation7 + $0x48] sm:$0xff]  ;;  %v251_v35 = vld [vmem:[#allocation8 + $0xa0] sm:$0xff] }
  0x62   :  { %161 = vmatprep.subr.mxu0 %v140_v11  ;;  %269 = vmatprep.subr.mxu1 %v256_v25  ;;  %v127_v36 = vld [vmem:[#allocation7 + $0x40] sm:$0xff]  ;;  %v250_v37 = vld [vmem:[#allocation8 + $0x98] sm:$0xff]  ;;  %v249_v39 = vld [vmem:[#allocation8 + $0x90] sm:$0xff] }
  0x63   :  { %162 = vmatpush1.msra.mxu0 %v139_v12  ;;  %270 = vmatpush1.msra.mxu1 %v255_v27  ;;  %v126_v38 = vld [vmem:[#allocation7 + $0x38] sm:$0xff]  ;;  %v125_v40 = vld [vmem:[#allocation7 + $0x30] sm:$0xff]  ;;  %v248_v41 = vld [vmem:[#allocation8 + $0x88] sm:$0xff] }
  0x64   :  { %163 = vmatprep.subr.mxu0 %v138_v13  ;;  %271 = vmatprep.subr.mxu1 %v254_v29  ;;  %v124_v42 = vld [vmem:[#allocation7 + $0x28] sm:$0xff]  ;;  %v247_v43 = vld [vmem:[#allocation8 + $0x80] sm:$0xff]  ;;  %v246_v45 = vld [vmem:[#allocation8 + $0x78] sm:$0xff] }
  0x65   :  { %164 = vmatpush1.msra.mxu0 %v137_v14  ;;  %272 = vmatpush1.msra.mxu1 %v253_v31  ;;  %v123_v44 = vld [vmem:[#allocation7 + $0x20] sm:$0xff]  ;;  %v122_v46 = vld [vmem:[#allocation7 + $0x18] sm:$0xff]  ;;  %v245_v47 = vld [vmem:[#allocation8 + $0x70] sm:$0xff] }
  0x66   :  { %165 = vmatprep.subr.mxu0 %v136_v18  ;;  %273 = vmatprep.subr.mxu1 %v252_v33  ;;  %v121_v48 = vld [vmem:[#allocation7 + $0x10] sm:$0xff]  ;;  %v244_v49 = vld [vmem:[#allocation8 + $0x68] sm:$0xff]  ;;  %v243_v51 = vld [vmem:[#allocation8 + $0x60] sm:$0xff] }
  0x67   :  { %166 = vmatpush1.msra.mxu0 %v135_v20  ;;  %274 = vmatpush1.msra.mxu1 %v251_v35  ;;  %v120_v50 = vld [vmem:[#allocation7 + $0x8] sm:$0xff]  ;;  %v119_v52 = vld [vmem:[#allocation7] sm:$0xff]  ;;  %v242_v53 = vld [vmem:[#allocation8 + $0x58] sm:$0xff] }
  0x68   :  { %167 = vmatprep.subr.mxu0 %v134_v22  ;;  %275 = vmatprep.subr.mxu1 %v250_v37  ;;  %v118_v54 = vld [vmem:[#allocation5] sm:$0xff]  ;;  %v385_v56 = vld [vmem:[#allocation8 + $0x1f0] sm:$0xff]  ;;  %v384_v58 = vld [vmem:[#allocation8 + $0x1e8] sm:$0xff] }
  0x69   :  { %168 = vmatpush1.msra.mxu0 %v133_v24  ;;  %276 = vmatpush1.msra.mxu1 %v249_v39  ;;  %v386_v55 = vld [vmem:[#allocation8 + $0x1f8] sm:$0xff]  ;;  %v241_v57 = vld [vmem:[#allocation8 + $0x50] sm:$0xff]  ;;  %v240_v59 = vld [vmem:[#allocation8 + $0x48] sm:$0xff] }
  0x6a   :  { %169 = vmatprep.subr.mxu0 %v132_v26  ;;  %277 = vmatprep.subr.mxu1 %v248_v41  ;;  %v383_v60 = vld [vmem:[#allocation8 + $0x1e0] sm:$0xff]  ;;  %v382_v62 = vld [vmem:[#allocation8 + $0x1d8] sm:$0xff]  ;;  %v381_v1 = vld [vmem:[#allocation8 + $0x1d0] sm:$0xff] }
  0x6b   :  { %170 = vmatpush1.msra.mxu0 %v131_v28  ;;  %278 = vmatpush1.msra.mxu1 %v247_v43  ;;  %v239_v61 = vld [vmem:[#allocation8 + $0x40] sm:$0xff]  ;;  %v238_v63 = vld [vmem:[#allocation8 + $0x38] sm:$0xff]  ;;  %v237_v2 = vld [vmem:[#allocation8 + $0x30] sm:$0xff] }
  0x6c   :  { %171 = vmatprep.subr.mxu0 %v130_v30  ;;  %279 = vmatprep.subr.mxu1 %v246_v45  ;;  %v380_v3 = vld [vmem:[#allocation8 + $0x1c8] sm:$0xff]  ;;  %v379_v5 = vld [vmem:[#allocation8 + $0x1c0] sm:$0xff]  ;;  %v378_v7 = vld [vmem:[#allocation8 + $0x1b8] sm:$0xff] }
  0x6d   :  { %172 = vmatpush1.msra.mxu0 %v129_v32  ;;  %280 = vmatpush1.msra.mxu1 %v245_v47  ;;  %v236_v4 = vld [vmem:[#allocation8 + $0x28] sm:$0xff]  ;;  %v235_v6 = vld [vmem:[#allocation8 + $0x20] sm:$0xff]  ;;  %v377_v8 = vld [vmem:[#allocation8 + $0x1b0] sm:$0xff] }
  0x6e   :  { %173 = vmatprep.subr.mxu0 %v128_v34  ;;  %281 = vmatprep.subr.mxu1 %v244_v49  ;;  %v376_v9 = vld [vmem:[#allocation8 + $0x1a8] sm:$0xff]  ;;  %v375_v10 = vld [vmem:[#allocation8 + $0x1a0] sm:$0xff]  ;;  %v374_v11 = vld [vmem:[#allocation8 + $0x198] sm:$0xff] }
  0x6f   :  { %174 = vmatpush1.msra.mxu0 %v127_v36  ;;  %282 = vmatpush1.msra.mxu1 %v243_v51  ;;  %v373_v12 = vld [vmem:[#allocation8 + $0x190] sm:$0xff]  ;;  %v372_v13 = vld [vmem:[#allocation8 + $0x188] sm:$0xff]  ;;  %v371_v14 = vld [vmem:[#allocation8 + $0x180] sm:$0xff] }
  0x70   :  { %175 = vmatprep.subr.mxu0 %v126_v38  ;;  %283 = vmatprep.subr.mxu1 %v242_v53  ;;  %v370_v15 = vld [vmem:[#allocation8 + $0x178] sm:$0xff]  ;;  %v369_v16 = vld [vmem:[#allocation8 + $0x170] sm:$0xff]  ;;  %v368_v17 = vld [vmem:[#allocation8 + $0x168] sm:$0xff] }
  0x71   :  { %176 = vmatpush1.msra.mxu0 %v125_v40  ;;  %284 = vmatpush1.msra.mxu1 %v241_v57  ;;  %v367_v18 = vld [vmem:[#allocation8 + $0x160] sm:$0xff]  ;;  %v366_v19 = vld [vmem:[#allocation8 + $0x158] sm:$0xff]  ;;  %v365_v20 = vld [vmem:[#allocation8 + $0x150] sm:$0xff] }
  0x72   :  { %177 = vmatprep.subr.mxu0 %v124_v42  ;;  %285 = vmatprep.subr.mxu1 %v240_v59  ;;  %v364_v21 = vld [vmem:[#allocation8 + $0x148] sm:$0xff]  ;;  %v363_v22 = vld [vmem:[#allocation8 + $0x140] sm:$0xff]  ;;  %v362_v23 = vld [vmem:[#allocation8 + $0x138] sm:$0xff] }
  0x73   :  { %178 = vmatpush1.msra.mxu0 %v123_v44  ;;  %286 = vmatpush1.msra.mxu1 %v239_v61  ;;  %v234_v24 = vld [vmem:[#allocation8 + $0x18] sm:$0xff]  ;;  %v361_v25 = vld [vmem:[#allocation8 + $0x130] sm:$0xff]  ;;  %v360_v27 = vld [vmem:[#allocation8 + $0x128] sm:$0xff] }
  0x74   :  { %179 = vmatprep.subr.mxu0 %v122_v46  ;;  %287 = vmatprep.subr.mxu1 %v238_v63  ;;  %v233_v26 = vld [vmem:[#allocation8 + $0x10] sm:$0xff]  ;;  %v232_v28 = vld [vmem:[#allocation8 + $0x8] sm:$0xff]  ;;  %v359_v29 = vld [vmem:[#allocation8 + $0x120] sm:$0xff] }
  0x75   :  { %180 = vmatpush1.msra.mxu0 %v121_v48  ;;  %288 = vmatpush1.msra.mxu1 %v237_v2  ;;  %v231_v30 = vld [vmem:[#allocation8] sm:$0xff]  ;;  %v358_v31 = vld [vmem:[#allocation8 + $0x118] sm:$0xff]  ;;  %v357_v32 = vld [vmem:[#allocation8 + $0x110] sm:$0xff] }
  0x76   :  { %181 = vmatprep.subr.mxu0 %v120_v50  ;;  %289 = vmatprep.subr.mxu1 %v236_v4  ;;  %v356_v33 = vld [vmem:[#allocation8 + $0x108] sm:$0xff]  ;;  %v355_v34 = vld [vmem:[#allocation8 + $0x100] sm:$0xff]  ;;  %v488_v42 = vld [vmem:[#allocation10 + $0x78] sm:$0xff] }
  0x77   :  { %182 = vmatpush1.msra.mxu0 %v119_v52  ;;  %290 = vmatpush1.msra.mxu1 %v235_v6  ;;  %v929_v35 = vld [vmem:[#allocation13 + $0x4] ss:$0 sm:$0xff]  ;;  %v932_v37 = vld [vmem:[#allocation13 + $0xc] ss:$0 sm:$0xff]  ;;  %v487_v44 = vld [vmem:[#allocation10 + $0x70] sm:$0xff] }
  0x78   :  { %216 = vmatmul.mubr.f32.vlgmr.msra.gmra.mxu0 %v118_v54  ;;  %387 = vmatprep.subr.mxu0 %v386_v55  ;;  %v486_v45 = vld [vmem:[#allocation10 + $0x68] sm:$0xff]  ;;  %v485_v46 = vld [vmem:[#allocation10 + $0x60] sm:$0xff]  ;;  %v484_v47 = vld [vmem:[#allocation10 + $0x58] sm:$0xff] }
  0x79   :  { %388 = vmatpush1.msra.mxu0 %v385_v56  ;;  %451 = vmatprep.mubr.f32.mxu0 %v1348_v0  ;;  %v483_v48 = vld [vmem:[#allocation10 + $0x50] sm:$0xff]  ;;  %v482_v49 = vld [vmem:[#allocation10 + $0x48] sm:$0xff]  ;;  %v481_v50 = vld [vmem:[#allocation10 + $0x40] sm:$0xff] }
  0x7a   :  { %389 = vmatprep.subr.mxu0 %v384_v58  ;;  %291 = vmatprep.subr.mxu1 %v234_v24  ;;  %v480_v51 = vld [vmem:[#allocation10 + $0x38] sm:$0xff]  ;;  %v479_v52 = vld [vmem:[#allocation10 + $0x30] sm:$0xff]  ;;  %v478_v53 = vld [vmem:[#allocation10 + $0x28] sm:$0xff] }
  0x7b   :  { %390 = vmatpush1.msra.mxu0 %v383_v60  ;;  %292 = vmatpush1.msra.mxu1 %v233_v26  ;;  %v477_v54 = vld [vmem:[#allocation10 + $0x20] sm:$0xff]  ;;  %v476_v55 = vld [vmem:[#allocation10 + $0x18] sm:$0xff]  ;;  %v475_v56 = vld [vmem:[#allocation10 + $0x10] sm:$0xff] }
  0x7c   :  { %391 = vmatprep.subr.mxu0 %v382_v62  ;;  %293 = vmatprep.subr.mxu1 %v232_v28  ;;  %v474_v57 = vld [vmem:[#allocation10 + $0x8] sm:$0xff]  ;;  %v473_v58 = vld [vmem:[#allocation10] sm:$0xff]  ;;  %v468_v59 = vld [vmem:[#allocation2] sm:$0xff] }
  0x7d   :  { %392 = vmatpush1.msra.mxu0 %v381_v1  ;;  %294 = vmatpush1.msra.mxu1 %v231_v30  ;;  %v579_v60 = vld [vmem:[#allocation11 + $0x78] sm:$0xff]  ;;  %v578_v61 = vld [vmem:[#allocation11 + $0x70] sm:$0xff]  ;;  %v577_v62 = vld [vmem:[#allocation11 + $0x68] sm:$0xff] }
  0x7e   :  { %393 = vmatprep.subr.mxu0 %v380_v3  ;;  %1009 = vmatprep.subr.mxu1 %v1348_v0  ;;  %v576_v63 = vld [vmem:[#allocation11 + $0x60] sm:$0xff]  ;;  %v575_v1 = vld [vmem:[#allocation11 + $0x58] sm:$0xff]  ;;  %v574_v2 = vld [vmem:[#allocation11 + $0x50] sm:$0xff] }
  0x7f   :  { %394 = vmatpush1.msra.mxu0 %v379_v5  ;;  %v573_v3 = vld [vmem:[#allocation11 + $0x48] sm:$0xff]  ;;  %v572_v4 = vld [vmem:[#allocation11 + $0x40] sm:$0xff]  ;;  %v571_v5 = vld [vmem:[#allocation11 + $0x38] sm:$0xff] }
  0x80   :  { %395 = vmatprep.subr.mxu0 %v378_v7  ;;  %v570_v6 = vld [vmem:[#allocation11 + $0x30] sm:$0xff]  ;;  %v569_v7 = vld [vmem:[#allocation11 + $0x28] sm:$0xff]  ;;  %v706_v30 = vld [vmem:[#allocation10 + $0xe0] sm:$0xff] }
  0x81   :  { %396 = vmatpush1.msra.mxu0 %v377_v8  ;;  %v568_v8 = vld [vmem:[#allocation11 + $0x20] sm:$0xff]  ;;  %v708_v28 = vld [vmem:[#allocation10 + $0xf0] sm:$0xff] }
  0x82   :  { %397 = vmatprep.subr.mxu0 %v376_v9  ;;  %v567_v9 = vld [vmem:[#allocation11 + $0x18] sm:$0xff] }
  0x83   :  { %398 = vmatpush1.msra.mxu0 %v375_v10  ;;  %v566_v10 = vld [vmem:[#allocation11 + $0x10] sm:$0xff] }
  0x84   :  { %399 = vmatprep.subr.mxu0 %v374_v11  ;;  %v565_v11 = vld [vmem:[#allocation11 + $0x8] sm:$0xff] }
  0x85   :  { %400 = vmatpush1.msra.mxu0 %v373_v12  ;;  %v564_v12 = vld [vmem:[#allocation11] sm:$0xff] }
  0x86   :  { %401 = vmatprep.subr.mxu0 %v372_v13  ;;  %v930_v13 = vld [vmem:[#allocation13 + $0x5] ss:$0 sm:$0xff] }
  0x87   :  { %402 = vmatpush1.msra.mxu0 %v371_v14 }
  0x88   :  { %403 = vmatprep.subr.mxu0 %v370_v15  ;;  %v937_v15 = vld [vmem:[#allocation13 + $0x3] ss:$0 sm:$0xff] }
  0x89   :  { %404 = vmatpush1.msra.mxu0 %v369_v16  ;;  %v931_v16 = vld [vmem:[#allocation13 + $0x6] ss:$0 sm:$0xff] }
  0x8a   :  { %405 = vmatprep.subr.mxu0 %v368_v17 }
  0x8b   :  { %406 = vmatpush1.msra.mxu0 %v367_v18 }
  0x8c   :  { %407 = vmatprep.subr.mxu0 %v366_v19 }
  0x8d   :  { %408 = vmatpush1.msra.mxu0 %v365_v20 }
  0x8e   :  { %409 = vmatprep.subr.mxu0 %v364_v21 }
  0x8f   :  { %410 = vmatpush1.msra.mxu0 %v363_v22  ;;  %v935_v22 = vld [vmem:[#allocation13] ss:$0 sm:$0xff] }
  0x90   :  { %411 = vmatprep.subr.mxu0 %v362_v23 }
  0x91   :  { %412 = vmatpush1.msra.mxu0 %v361_v25 }
  0x92   :  { %413 = vmatprep.subr.mxu0 %v360_v27  ;;  %v709_v27 = vld [vmem:[#allocation10 + $0xf8] sm:$0xff] }
  0x93   :  { %414 = vmatpush1.msra.mxu0 %v359_v29  ;;  %v707_v29 = vld [vmem:[#allocation10 + $0xe8] sm:$0xff] }
  0x94   :  { %415 = vmatprep.subr.mxu0 %v358_v31  ;;  %v705_v31 = vld [vmem:[#allocation10 + $0xd8] sm:$0xff] }
  0x95   :  { %416 = vmatpush1.msra.mxu0 %v357_v32  ;;  %v704_v32 = vld [vmem:[#allocation10 + $0xd0] sm:$0xff] }
  0x96   :  { %417 = vmatprep.subr.mxu0 %v356_v33  ;;  %v703_v33 = vld [vmem:[#allocation10 + $0xc8] sm:$0xff] }
  0x97   :  { %418 = vmatpush1.msra.mxu0 %v355_v34  ;;  %v702_v34 = vld [vmem:[#allocation10 + $0xc0] sm:$0xff] }
  0x98   :  { %1044 = vmatprep.subr.mxu0 %v1348_v0 }
 0x138   :  { %v217_v36 = vpop.f32.mrf.mxu0 }
 0x139   :  { %v229_v38 = vadd.f32 %v929_v35, %v217_v36  ;;  %v701_v35 = vld [vmem:[#allocation10 + $0xb8] sm:$0xff]  ;;  %v700_v36 = vld [vmem:[#allocation10 + $0xb0] sm:$0xff] }
 0x13a   :  { %v219_v39 = vpop.f32.mrf.mxu0 }
 0x13b   :  { %v230_v40 = vmax.f32 %v229_v38, 0.0  ;;  %v352_v41 = vadd.f32 %v932_v37, %v219_v39  ;;  %v699_v37 = vld [vmem:[#allocation10 + $0xa8] sm:$0xff]  ;;  %v698_v38 = vld [vmem:[#allocation10 + $0xa0] sm:$0xff]  ;;  %v697_v39 = vld [vmem:[#allocation10 + $0x98] sm:$0xff] }
 0x13d   :  { %v353_v43 = vmax.f32 %v352_v41, 0.0  ;;  %328 = vmatmul.mubr.f32.vlgmr.msra.gmra.mxu1 %v230_v40  ;;  %v696_v40 = vld [vmem:[#allocation10 + $0x90] sm:$0xff]  ;;  %v695_v41 = vld [vmem:[#allocation10 + $0x88] sm:$0xff] }
 0x13e   :  { %1010 = vmatpush3.msra.mxu1 %v488_v42  ;;  %1041 = vmatprep.mubr.msk.f32.mxu1 %vm1349_vm0, %v1348_v0  ;;  %v694_v42 = vld [vmem:[#allocation10 + $0x80] sm:$0xff] }
 0x13f   :  { %1011 = vmatprep.subr.mxu1 %v1348_v0  ;;  %452 = vmatmul.mubr.f32.vlgmr.msra.gmra.mxu0 %v353_v43  ;;  %v801_v43 = vld [vmem:[#allocation11 + $0xf8] sm:$0xff] }
 0x140   :  { %1012 = vmatpush3.msra.mxu1 %v487_v44  ;;  %1076 = vmatprep.mubr.msk.f32.mxu0 %vm1349_vm0, %v1348_v0  ;;  %v800_v44 = vld [vmem:[#allocation11 + $0xf0] sm:$0xff] }
 0x141   :  { %1013 = vmatprep.subr.mxu1 %v1348_v0  ;;  %1045 = vmatpush3.msra.mxu0 %v579_v60 }
 0x142   :  { %1014 = vmatpush3.msra.mxu1 %v486_v45  ;;  %1046 = vmatprep.subr.mxu0 %v1348_v0  ;;  %v799_v45 = vld [vmem:[#allocation11 + $0xe8] sm:$0xff] }
 0x143   :  { %1015 = vmatprep.subr.mxu1 %v1348_v0  ;;  %1047 = vmatpush3.msra.mxu0 %v578_v61 }
 0x144   :  { %1016 = vmatpush3.msra.mxu1 %v485_v46  ;;  %1048 = vmatprep.subr.mxu0 %v1348_v0  ;;  %v798_v46 = vld [vmem:[#allocation11 + $0xe0] sm:$0xff] }
 0x145   :  { %1017 = vmatprep.subr.mxu1 %v1348_v0  ;;  %1049 = vmatpush3.msra.mxu0 %v577_v62 }
 0x146   :  { %1018 = vmatpush3.msra.mxu1 %v484_v47  ;;  %1050 = vmatprep.subr.mxu0 %v1348_v0  ;;  %v797_v47 = vld [vmem:[#allocation11 + $0xd8] sm:$0xff] }
 0x147   :  { %1019 = vmatprep.subr.mxu1 %v1348_v0  ;;  %1051 = vmatpush3.msra.mxu0 %v576_v63 }
 0x148   :  { %1020 = vmatpush3.msra.mxu1 %v483_v48  ;;  %1052 = vmatprep.subr.mxu0 %v1348_v0  ;;  %v796_v48 = vld [vmem:[#allocation11 + $0xd0] sm:$0xff] }
 0x149   :  { %1021 = vmatprep.subr.mxu1 %v1348_v0  ;;  %1053 = vmatpush3.msra.mxu0 %v575_v1 }
 0x14a   :  { %1022 = vmatpush3.msra.mxu1 %v482_v49  ;;  %1054 = vmatprep.subr.mxu0 %v1348_v0  ;;  %v795_v49 = vld [vmem:[#allocation11 + $0xc8] sm:$0xff] }
 0x14b   :  { %1023 = vmatprep.subr.mxu1 %v1348_v0  ;;  %1055 = vmatpush3.msra.mxu0 %v574_v2 }
 0x14c   :  { %1024 = vmatpush3.msra.mxu1 %v481_v50  ;;  %1056 = vmatprep.subr.mxu0 %v1348_v0  ;;  %v794_v50 = vld [vmem:[#allocation11 + $0xc0] sm:$0xff] }
 0x14d   :  { %1025 = vmatprep.subr.mxu1 %v1348_v0  ;;  %1057 = vmatpush3.msra.mxu0 %v573_v3 }
 0x14e   :  { %1026 = vmatpush3.msra.mxu1 %v480_v51  ;;  %1058 = vmatprep.subr.mxu0 %v1348_v0  ;;  %v793_v51 = vld [vmem:[#allocation11 + $0xb8] sm:$0xff] }
 0x14f   :  { %1027 = vmatprep.subr.mxu1 %v1348_v0  ;;  %1059 = vmatpush3.msra.mxu0 %v572_v4 }
 0x150   :  { %1028 = vmatpush3.msra.mxu1 %v479_v52  ;;  %1060 = vmatprep.subr.mxu0 %v1348_v0  ;;  %v792_v52 = vld [vmem:[#allocation11 + $0xb0] sm:$0xff] }
 0x151   :  { %1029 = vmatprep.subr.mxu1 %v1348_v0  ;;  %1061 = vmatpush3.msra.mxu0 %v571_v5 }
 0x152   :  { %1030 = vmatpush3.msra.mxu1 %v478_v53  ;;  %1062 = vmatprep.subr.mxu0 %v1348_v0  ;;  %v791_v53 = vld [vmem:[#allocation11 + $0xa8] sm:$0xff] }
 0x153   :  { %1031 = vmatprep.subr.mxu1 %v1348_v0  ;;  %1063 = vmatpush3.msra.mxu0 %v570_v6 }
 0x154   :  { %1032 = vmatpush3.msra.mxu1 %v477_v54  ;;  %1064 = vmatprep.subr.mxu0 %v1348_v0  ;;  %v790_v54 = vld [vmem:[#allocation11 + $0xa0] sm:$0xff] }
 0x155   :  { %1033 = vmatprep.subr.mxu1 %v1348_v0  ;;  %1065 = vmatpush3.msra.mxu0 %v569_v7 }
 0x156   :  { %1034 = vmatpush3.msra.mxu1 %v476_v55  ;;  %1066 = vmatprep.subr.mxu0 %v1348_v0  ;;  %v789_v55 = vld [vmem:[#allocation11 + $0x98] sm:$0xff] }
 0x157   :  { %1035 = vmatprep.subr.mxu1 %v1348_v0  ;;  %1067 = vmatpush3.msra.mxu0 %v568_v8 }
 0x158   :  { %1036 = vmatpush3.msra.mxu1 %v475_v56  ;;  %1068 = vmatprep.subr.mxu0 %v1348_v0 }
 0x159   :  { %1037 = vmatprep.subr.mxu1 %v1348_v0  ;;  %1069 = vmatpush3.msra.mxu0 %v567_v9 }
 0x15a   :  { %1038 = vmatpush3.msra.mxu1 %v474_v57  ;;  %1070 = vmatprep.subr.mxu0 %v1348_v0 }
 0x15b   :  { %1039 = vmatprep.subr.mxu1 %v1348_v0  ;;  %1071 = vmatpush3.msra.mxu0 %v566_v10 }
 0x15c   :  { %1040 = vmatpush3.msra.mxu1 %v473_v58  ;;  %1072 = vmatprep.subr.mxu0 %v1348_v0  ;;  %v936_v58 = vld [vmem:[#allocation13 + $0x1] ss:$0 sm:$0xff] }
 0x15d   :  { %1042 = vmatmul.mubr.f32.vlgmr.msra.gmra.mxu1 %v468_v59  ;;  %1079 = vmatprep.subr.mxu1 %v1348_v0 }
 0x15e   :  { %1111 = vmatprep.mubr.msk.f32.mxu1 %vm1349_vm0, %v1348_v0  ;;  %1073 = vmatpush3.msra.mxu0 %v565_v11 }
 0x15f   :  { %1074 = vmatprep.subr.mxu0 %v1348_v0  ;;  %1080 = vmatpush3.msra.mxu1 %v709_v27 }
 0x160   :  { %1075 = vmatpush3.msra.mxu0 %v564_v12  ;;  %1081 = vmatprep.subr.mxu1 %v1348_v0 }
 0x161   :  { %1114 = vmatprep.subr.mxu0 %v1348_v0  ;;  %1082 = vmatpush3.msra.mxu1 %v708_v28 }
 0x162   :  { %1083 = vmatprep.subr.mxu1 %v1348_v0 }
 0x163   :  { %1084 = vmatpush3.msra.mxu1 %v707_v29 }
 0x164   :  { %1085 = vmatprep.subr.mxu1 %v1348_v0 }
 0x165   :  { %1086 = vmatpush3.msra.mxu1 %v706_v30 }
 0x166   :  { %1087 = vmatprep.subr.mxu1 %v1348_v0 }
 0x167   :  { %1088 = vmatpush3.msra.mxu1 %v705_v31 }
 0x168   :  { %1089 = vmatprep.subr.mxu1 %v1348_v0 }
 0x169   :  { %1090 = vmatpush3.msra.mxu1 %v704_v32  ;;  %v788_v32 = vld [vmem:[#allocation11 + $0x90] sm:$0xff] }
 0x16a   :  { %1091 = vmatprep.subr.mxu1 %v1348_v0 }
 0x16b   :  { %1092 = vmatpush3.msra.mxu1 %v703_v33  ;;  %v787_v33 = vld [vmem:[#allocation11 + $0x88] sm:$0xff] }
 0x16c   :  { %1093 = vmatprep.subr.mxu1 %v1348_v0 }
 0x16d   :  { %1094 = vmatpush3.msra.mxu1 %v702_v34  ;;  %v786_v34 = vld [vmem:[#allocation11 + $0x80] sm:$0xff] }
 0x16e   :  { %1095 = vmatprep.subr.mxu1 %v1348_v0 }
 0x16f   :  { %1096 = vmatpush3.msra.mxu1 %v701_v35  ;;  %v938_v35 = vld [vmem:[#allocation13 + $0x8] ss:$0 sm:$0xff] }
 0x170   :  { %1097 = vmatprep.subr.mxu1 %v1348_v0 }
 0x171   :  { %1098 = vmatpush3.msra.mxu1 %v700_v36 }
 0x172   :  { %1099 = vmatprep.subr.mxu1 %v1348_v0 }
 0x173   :  { %1100 = vmatpush3.msra.mxu1 %v699_v37 }
 0x174   :  { %1101 = vmatprep.subr.mxu1 %v1348_v0 }
 0x175   :  { %1102 = vmatpush3.msra.mxu1 %v698_v38  ;;  %v939_v38 = vld [vmem:[#allocation13 + $0x9] ss:$0 sm:$0xff] }
 0x176   :  { %1103 = vmatprep.subr.mxu1 %v1348_v0 }
 0x177   :  { %1104 = vmatpush3.msra.mxu1 %v697_v39 }
 0x178   :  { %1105 = vmatprep.subr.mxu1 %v1348_v0 }
 0x179   :  { %1106 = vmatpush3.msra.mxu1 %v696_v40 }
 0x17a   :  { %1107 = vmatprep.subr.mxu1 %v1348_v0 }
 0x17b   :  { %1108 = vmatpush3.msra.mxu1 %v695_v41 }
 0x17c   :  { %1109 = vmatprep.subr.mxu1 %v1348_v0 }
 0x17d   :  { %1110 = vmatpush3.msra.mxu1 %v694_v42 }
 0x1fd   :  { %v329_v14 = vpop.f32.mrf.mxu1 }
 0x1fe   :  { %v1470_v17 = vadd.f32 %v930_v13, %v329_v14 }
 0x1ff   :  { %v331_v18 = vpop.f32.mrf.mxu1  ;;  %v1510_v56 = vpop.f32.mrf.mxu0 }
 0x200   :  { %v683_v19 = vmul.f32 %v937_v15, %v1470_v17  ;;  %v343_v20 = vadd.f32 %v931_v16, %v331_v18  ;;  %v674_v16 = vlaneseq }
 0x201   :  { %v1512_v57 = vpop.f32.mrf.mxu0 }
 0x202   :  { %v1473_v21 = vadd.f32 %v683_v19, %v343_v20  ;;  %v675_v18 = vshrl.u32 %v674_v16, 7  ;;  %v471_v19 = vld [vmem:[#allocation13 + $0x2] sm:$0x1] }
 0x204   :  { %v676_v20 = vsub.s32 0, %v675_v18 }
 0x21d   :  { %v559_v23 = vpop.f32.mrf.mxu1 }
 0x21e   :  { %v1475_v24 = vadd.f32 %v935_v22, %v559_v23 }
 0x21f   :  { %v1043_v25 = vpop.f32.mrf.mxu1 }
 0x220   :  { %v563_v26 = vmax.f32 %v1475_v24, 0.0 }
 0x222   :  { %1077 = vmatmul.mubr.f32.vlgmr.msra.gmra.mxu0 %v563_v26 }
 0x223   :  { %1146 = vmatprep.mubr.msk.f32.mxu0 %vm1349_vm0, %v1348_v0  ;;  %1115 = vmatpush3.msra.mxu0 %v801_v43 }
 0x224   :  { %1116 = vmatprep.subr.mxu0 %v1348_v0 }
 0x225   :  { %1117 = vmatpush3.msra.mxu0 %v800_v44 }
 0x226   :  { %1118 = vmatprep.subr.mxu0 %v1348_v0 }
 0x227   :  { %1119 = vmatpush3.msra.mxu0 %v799_v45 }
 0x228   :  { %1120 = vmatprep.subr.mxu0 %v1348_v0 }
 0x229   :  { %1121 = vmatpush3.msra.mxu0 %v798_v46 }
 0x22a   :  { %1122 = vmatprep.subr.mxu0 %v1348_v0 }
 0x22b   :  { %1123 = vmatpush3.msra.mxu0 %v797_v47 }
 0x22c   :  { %1124 = vmatprep.subr.mxu0 %v1348_v0 }
 0x22d   :  { %1125 = vmatpush3.msra.mxu0 %v796_v48 }
 0x22e   :  { %1126 = vmatprep.subr.mxu0 %v1348_v0 }
 0x22f   :  { %1127 = vmatpush3.msra.mxu0 %v795_v49 }
 0x230   :  { %1128 = vmatprep.subr.mxu0 %v1348_v0 }
 0x231   :  { %1129 = vmatpush3.msra.mxu0 %v794_v50 }
 0x232   :  { %1130 = vmatprep.subr.mxu0 %v1348_v0 }
 0x233   :  { %1131 = vmatpush3.msra.mxu0 %v793_v51 }
 0x234   :  { %1132 = vmatprep.subr.mxu0 %v1348_v0 }
 0x235   :  { %1133 = vmatpush3.msra.mxu0 %v792_v52 }
 0x236   :  { %1134 = vmatprep.subr.mxu0 %v1348_v0 }
 0x237   :  { %1135 = vmatpush3.msra.mxu0 %v791_v53 }
 0x238   :  { %1136 = vmatprep.subr.mxu0 %v1348_v0 }
 0x239   :  { %1137 = vmatpush3.msra.mxu0 %v790_v54 }
 0x23a   :  { %1138 = vmatprep.subr.mxu0 %v1348_v0 }
 0x23b   :  { %1139 = vmatpush3.msra.mxu0 %v789_v55 }
 0x23c   :  { %1140 = vmatprep.subr.mxu0 %v1348_v0 }
 0x23d   :  { %1141 = vmatpush3.msra.mxu0 %v788_v32 }
 0x23e   :  { %1142 = vmatprep.subr.mxu0 %v1348_v0 }
 0x23f   :  { %1143 = vmatpush3.msra.mxu0 %v787_v33 }
 0x240   :  { %1144 = vmatprep.subr.mxu0 %v1348_v0 }
 0x241   :  { %1145 = vmatpush3.msra.mxu0 %v786_v34 }
 0x2e2   :  { %v650_v59 = vpop.f32.mrf.mxu0 }
 0x2e3   :  { %v651_v60 = vadd.f32 %v936_v58, %v650_v59  ;;  %v933_v58 = vld [vmem:[#allocation13 + $0xd] ss:$0 sm:$0xff]  ;;  %v691_v59 = vld [vmem:[#allocation13 + $0xa] sm:$0x1] }
 0x2e4   :  { %v1078_v61 = vpop.f32.mrf.mxu0 }
 0x2e5   :  { %v654_v62 = vrot.slane %v651_v60, 4 }
 0x2e7   :  { %v655_v63 = vadd.f32 %v654_v62, %v651_v60  ;;  %v940_v62 = vld [vmem:[#allocation13 + $0xb] ss:$0 sm:$0xff] }
 0x2e9   :  { %v656_v1 = vrot.slane %v655_v63, 2 }
 0x2eb   :  { %v657_v2 = vadd.f32 %v656_v1, %v655_v63  ;;  %v934_v63 = vld [vmem:[#allocation13 + $0xe] ss:$0 sm:$0xff] }
 0x2ed   :  { %v658_v3 = vrot.slane %v657_v2, 1 }
 0x2ef   :  { %v659_v4 = vadd.f32 %v658_v3, %v657_v2  ;;  %v467_v3 = vadd.f32 %v934_v63, %v1512_v57 }
 0x2f1   :  { %v661_v5 = vmul.f32 0.125, %v659_v4 }
 0x2f3   :  { %v662_v6 = vsub.f32 %v651_v60, %v661_v5  ;;  %v462_v60 = vadd.f32 %v933_v58, %v1510_v56 }
 0x2f5   :  { %v663_v7 = vmul.f32 %v662_v6, %v662_v6  ;;  %v904_v2 = vmul.f32 %v940_v62, %v462_v60 }
 0x2f7   :  { %v664_v8 = vrot.slane %v663_v7, 4 }
 0x2f9   :  { %v665_v9 = vadd.f32 %v664_v8, %v663_v7 }
 0x2fb   :  { %v666_v10 = vrot.slane %v665_v9, 2 }
 0x2fd   :  { %v667_v11 = vadd.f32 %v666_v10, %v665_v9 }
 0x2ff   :  { %v668_v12 = vrot.slane %v667_v11, 1 }
 0x301   :  { %v669_v13 = vadd.f32 %v668_v12, %v667_v11 }
 0x303   :  { %v670_v14 = vmul.f32 0.125, %v669_v13 }
 0x305   :  { %v671_v15 = vadd.f32 1e-05, %v670_v14 }
 0x307   :  { %1163 = vrsqrt.f32 %v671_v15 }
 0x314   :  { %v1164_v22 = vpop.eup %1163 }
 0x315   :  { %v673_v23 = vmul.f32 %v1164_v22, %v471_v19 }
 0x317   :  { %v677_v25 = vrot.slane %v673_v23, %v676_v20 }
 0x319   :  { %v678_v27 = vmul.f32 %v677_v25, %v1470_v17 }
 0x31b   :  { %v685_v28 = vmul.f32 %v678_v27, %v662_v6  ;;  %v905_v6 = vadd.f32 %v904_v2, %v467_v3 }
 0x31d   :  { %v686_v29 = vadd.f32 %v685_v28, %v1473_v21 }
 0x31f   :  { %v687_v30 = vmax.f32 %v686_v29, 0.0 }
 0x321   :  { %v688_v31 = vadd.f32 %v687_v30, %v563_v26 }
 0x323   :  { %1112 = vmatmul.mubr.f32.vlgmr.msra.gmra.mxu1 %v688_v31 }
 0x3e3   :  { %v780_v17 = vpop.f32.mrf.mxu1 }
 0x3e4   :  { %v781_v36 = vadd.f32 %v938_v35, %v780_v17 }
 0x3e5   :  { %v1113_v37 = vpop.f32.mrf.mxu1 }
 0x3e6   :  { %v784_v21 = vmax.f32 %v781_v36, 0.0 }
 0x3e8   :  { %1147 = vmatmul.mubr.f32.vlgmr.msra.gmra.mxu0 %v784_v21 }
 0x4a8   :  { %v872_v24 = vpop.f32.mrf.mxu0 }
 0x4a9   :  { %v873_v26 = vadd.f32 %v939_v38, %v872_v24 }
 0x4aa   :  { %v1148_v39 = vpop.f32.mrf.mxu0 }
 0x4ab   :  { %v876_v40 = vrot.slane %v873_v26, 4 }
 0x4ad   :  { %v877_v41 = vadd.f32 %v876_v40, %v873_v26 }
 0x4af   :  { %v878_v42 = vrot.slane %v877_v41, 2 }
 0x4b1   :  { %v879_v43 = vadd.f32 %v878_v42, %v877_v41 }
 0x4b3   :  { %v880_v44 = vrot.slane %v879_v43, 1 }
 0x4b5   :  { %v881_v45 = vadd.f32 %v880_v44, %v879_v43 }
 0x4b7   :  { %v882_v46 = vmul.f32 0.125, %v881_v45 }
 0x4b9   :  { %v883_v0 = vsub.f32 %v873_v26, %v882_v46 }
 0x4bb   :  { %v884_v47 = vmul.f32 %v883_v0, %v883_v0 }
 0x4bd   :  { %v885_v48 = vrot.slane %v884_v47, 4 }
 0x4bf   :  { %v886_v49 = vadd.f32 %v885_v48, %v884_v47 }
 0x4c1   :  { %v887_v50 = vrot.slane %v886_v49, 2 }
 0x4c3   :  { %v888_v51 = vadd.f32 %v887_v50, %v886_v49 }
 0x4c5   :  { %v889_v52 = vrot.slane %v888_v51, 1 }
 0x4c7   :  { %v890_v53 = vadd.f32 %v889_v52, %v888_v51 }
 0x4c9   :  { %v891_v54 = vmul.f32 0.125, %v890_v53 }
 0x4cb   :  { %v892_v55 = vadd.f32 1e-05, %v891_v54 }
 0x4cd   :  { %1165 = vrsqrt.f32 %v892_v55 }
 0x4da   :  { %v1166_v61 = vpop.eup %1165 }
 0x4db   :  { %v894_v1 = vmul.f32 %v1166_v61, %v691_v59 }
 0x4dd   :  { %v898_v4 = vrot.slane %v894_v1, %v676_v20 }
 0x4df   :  { %v899_v5 = vmul.f32 %v898_v4, %v462_v60 }
 0x4e1   :  { %v906_v7 = vmul.f32 %v899_v5, %v883_v0 }
 0x4e3   :  { %v907_v8 = vadd.f32 %v906_v7, %v905_v6 }
 0x4e5   :  { %v908_v9 = vmax.f32 %v907_v8, 0.0 }
 0x4e7   :  { %v909_v10 = vadd.f32 %v908_v9, %v784_v21 }
 0x4e9   :  { %910 = vst [vmem:[#allocation14] sm:$0xff] %v909_v10 }
 0x4ea   :  { %1318 = shalt.err (!%p1315_p11)
}
 0x4eb   :  { %920 = dma.vmem_to_hbm [thread:$0]  %s918_s6, 128, %s1532_s7, [#allocation4]  }
 0x4ec   :  { %1335 = dma.done.wait [#allocation4], 128  }
 0x4ed   :  { %1336 = vsyncadd [#allocation4], 4294967168 }
 0x4ee   :  { %924 = vsyncpa [#allocation3], 1 }
 0x4ef   :  { %925 = vsyncpa [#allocation6], 1 }
 0x4f0   :  { %926 = vsyncpa [#allocation9], 1 }
 0x4f1   :  { %927 = vsyncpa [#allocation12], 1 }
 0x4f2   :  { %928 = vsyncpa [#allocation4], 1 }

</bundles_post_ra>
